<compile_context>
chip_gen: v7x
topology: tpu7x:2x2x1
jax: 0.10.0
libtpu: 0.0.40
codegen_flags: <defaults>
</compile_context>

<pallas_src>
import jax
import jax.numpy as jnp
from jax.experimental import pallas as pl
from jax.experimental.pallas import tpu as pltpu


def _matmul_kernel(w_ref, x_ref, y_ref):
    # y_tile = W (2,4) @ x_tile (4, TN) -> (2, TN).  Tiny lhs, one MXU op per tile.
    y_ref[...] = jnp.dot(
        w_ref[...], x_ref[...], preferred_element_type=jnp.float32
    ).astype(y_ref.dtype)


def mymodule_forward(weight1, weight2, x, *, cols_per_step=131072):
    """y = weight2 @ x (the only executable reading of MyModule.forward).

    weight1 is accepted for parity with the module but its product is dead
    code in the original forward.  x: (4, N) -> y: (2, N).
    """
    del weight1  # TODO(synk): dead in the only shape-valid reading of forward.

    M, K = weight2.shape          # (2, 4)
    K2, N = x.shape
    assert K2 == K, f"x must have {K} rows, got {K2}"

    w = jnp.asarray(weight2, jnp.float32)
    x = jnp.asarray(x, jnp.float32)

    # Tiny-N hedge: below one 128-lane block, pad to exactly one block.  The
    # pad/slice here moves < 2 KiB, unlike the old pad-to-tile full copies.
    n_call = N
    if N < 128:
        x = jnp.pad(x, ((0, 0), (0, 128 - N)))
        n_call = 128

    n128 = pl.cdiv(n_call, 128) * 128

    # Bytes per column = (read 4 + write 2) * 4 B = 24 B, so 128K columns per
    # step ~= 3 MiB of combined HBM traffic -> the ~0.35 us per-step pipeline
    # overhead is well amortized on v5e/v6e/v7x.
    num_tiles = pl.cdiv(n128, cols_per_step)
    # v7x has 2 TensorCores; once each half still gets >= 64K columns, use at
    # least 2 parallel tiles so the second core is not idle.
    if num_tiles < 2 and n128 >= 2 * 65536:
        num_tiles = 2
    tn = pl.cdiv(pl.cdiv(n128, num_tiles), 128) * 128   # lane-dense tile width
    grid_n = pl.cdiv(n_call, tn)

    y = pl.pallas_call(
        _matmul_kernel,
        out_shape=jax.ShapeDtypeStruct((M, n_call), jnp.float32),
        grid=(grid_n,),
        in_specs=[
            # Tiny (2,4) weight: same block every grid step (no re-fetch cost).
            pl.BlockSpec((M, K), lambda j: (0, 0)),
            # x streamed in lane-dense tiles along N; a ragged last block is
            # handled by Pallas (OOB reads padded, OOB output lanes dropped).
            pl.BlockSpec((K, tn), lambda j: (0, j)),
        ],
        out_specs=pl.BlockSpec((M, tn), lambda j: (0, j)),
        compiler_params=pltpu.CompilerParams(
            dimension_semantics=("parallel",),
            vmem_limit_bytes=32 << 20,
        ),
        cost_estimate=pl.CostEstimate(
            flops=2 * M * K * N,
            transcendentals=0,
            bytes_accessed=4 * (K * N + M * N + M * K),
        ),
    )(w, x)

    return y[:, :N] if n_call != N else y


if __name__ == "__main__":
    key = jax.random.PRNGKey(0)
    k1, k2, kx = jax.random.split(key, 3)

    # Mirrors torch.rand(2, 4) parameters; x is (4, N) so the mms apply.
    weight1 = jax.random.uniform(k1, (2, 4), dtype=jnp.float32)
    weight2 = jax.random.uniform(k2, (2, 4), dtype=jnp.float32)
    x = jax.random.uniform(kx, (4, 8), dtype=jnp.float32)

    # Small-N path: single 128-lane block, tiny pad/slice.
    y = jax.block_until_ready(mymodule_forward(weight1, weight2, x))
    ref = weight2 @ x
    assert y.shape == (2, 8), y.shape
    assert jnp.allclose(y, ref, atol=1e-5, rtol=1e-5), "mismatch (small N)"

    # Multi-tile path: N = 512 with forced 128-wide tiles -> grid of 4
    # parallel tiles, no padding, no output slice.
    x_big = jax.random.uniform(kx, (4, 512), dtype=jnp.float32)
    y_big = jax.block_until_ready(
        mymodule_forward(weight1, weight2, x_big, cols_per_step=128)
    )
    ref_big = weight2 @ x_big
    assert y_big.shape == (2, 512), y_big.shape
    assert jnp.allclose(y_big, ref_big, atol=1e-5, rtol=1e-5), "mismatch (tiled)"

    print("KERNEL_OK")
</pallas_src>

<mosaic_0001>
module attributes {stable_mosaic.version = 11 : i64} {
  func.func @_matmul_kernel(%arg0: i32, %arg1: memref<2x4xf32, #tpu.memory_space<vmem>>, %arg2: memref<4x128xf32, #tpu.memory_space<vmem>>, %arg3: memref<2x128xf32, #tpu.memory_space<vmem>>) attributes {dimension_semantics = [#tpu.dimension_semantics<parallel>], iteration_bounds = array<i64: 1>, scalar_prefetch = 0 : i64, scratch_operands = 0 : i64, tpu.core_type = #tpu.core_type<tc>, window_params = [{pipeline_mode = #tpu.pipeline_mode<synchronous>, transform_indices = @transform_0, window_bounds = array<i64: 2, 4>}, {transform_indices = @transform_1, window_bounds = array<i64: 4, 128>}, {transform_indices = @transform_2, window_bounds = array<i64: 2, 128>}]} {
    %c0 = arith.constant 0 : index
    %c0_0 = arith.constant 0 : index
    %0 = vector.load %arg1[%c0, %c0_0] : memref<2x4xf32, #tpu.memory_space<vmem>>, vector<2x4xf32>
    %c0_1 = arith.constant 0 : index
    %c0_2 = arith.constant 0 : index
    %1 = vector.load %arg2[%c0_1, %c0_2] : memref<4x128xf32, #tpu.memory_space<vmem>>, vector<4x128xf32>
    %cst = arith.constant dense<0.000000e+00> : vector<2x128xf32>
    %2 = tpu.matmul %0, %1, %cst {dimension_numbers = #tpu.dot_dimension_numbers<[1], [0], [0], [1], [0, 0, 1, 1], [], []>} : vector<2x4xf32>, vector<4x128xf32>, vector<2x128xf32> -> vector<2x128xf32>
    %c0_3 = arith.constant 0 : index
    %c0_4 = arith.constant 0 : index
    %3 = vector.load %arg3[%c0_3, %c0_4] : memref<2x128xf32, #tpu.memory_space<vmem>>, vector<2x128xf32>
    tpu.vector_store %arg3[%c0_3, %c0_4], %2 {strides = array<i32>} : memref<2x128xf32, #tpu.memory_space<vmem>>, vector<2x128xf32>,
    return
  }
  func.func @transform_0(%arg0: i32) -> (i32, i32) {
    %c0_i32 = arith.constant 0 : i32
    %c0_i32_0 = arith.constant 0 : i32
    %c0_i32_1 = arith.constant 0 : i32
    return %c0_i32, %c0_i32_0 : i32, i32
  }
  func.func @transform_1(%arg0: i32) -> (i32, i32) {
    %c0_i32 = arith.constant 0 : i32
    %c0_i32_0 = arith.constant 0 : i32
    return %c0_i32, %arg0 : i32, i32
  }
  func.func @transform_2(%arg0: i32) -> (i32, i32) {
    %c0_i32 = arith.constant 0 : i32
    %c0_i32_0 = arith.constant 0 : i32
    return %c0_i32, %arg0 : i32, i32
  }
}

</mosaic_0001>

<bundles_post_ra>
// kernel: tpu_custom_call.1
= control target key start
LH: loop header
LB: loop body
LE: loop exit
PB: predicated region body
PF: predicated region fallthrough
CT: control target
= control target key end

     0   :  { %7 = vsyncpa [#allocation3], 0  ;;  %s275_s0 = inlined_call_operand.hbm [shape: f32[2,4], index: 0, kind: input, shape index: {}]   ;;  %s276_s1 = inlined_call_operand.hbm [shape: f32[4,128], index: 1, kind: input, shape index: {}]   ;;  %s277_s2 = inlined_call_operand.hbm [shape: f32[2,128], index: 2, kind: output, shape index: {}]  }
   0x1   :  { %8 = vsyncpa [#allocation6], 0 }
   0x2   :  { %9 = vsyncpa [#allocation4], 0  ;;  %s219_s9 = smov [#allocation2]   ;;  %s220_s11 = smov [#allocation5]  }
   0x3   :  { %s16_s10 = sshll.u32 %s219_s9, 4  ;;  %s26_s12 = sshll.u32 %s220_s11, 4  ;;  %s17_s10 = int_to_ptr.vmem [resolvable:$true] %s16_s10  ;;  %s27_s12 = int_to_ptr.vmem [resolvable:$true] %s26_s12 }
   0x4   :  { %s147_s15 = scalar_lea.hbm %s275_s0, 32 }
   0x5   :  { %p148_p0 = scmp.ne.s32.totalorder %s275_s0, %s147_s15  ;;  %p151_p1 = scmp.lt.u32.totalorder %s147_s15, %s275_s0 }
   0x7   :  { %p153_p2 = pnand %p151_p1, %p148_p0 }
   0x9   :  { %156 = shalt.err (!%p153_p2)
}
   0xa   :  { %s157_s20 = scalar_lea.vmem %s17_s10, 32  ;;  %p162_p4 = scmp.lt.s32.totalorder %s17_s10, %s17_s10 }
   0xb   :  { %p158_p3 = scmp.ne.s32.totalorder %s17_s10, %s157_s20  ;;  %p163_p5 = scmp.lt.s32.totalorder %s157_s20, %s157_s20 }
   0xd   :  { %p164_p6 = por %p163_p5, %p162_p4 }
   0xf   :  { %p165_p7 = pnand %p164_p6, %p158_p3 }
  0x11   :  { %168 = shalt.err (!%p165_p7)
}
  0x12   :  { %19 = dma.hbm_to_vmem [thread:$0]  %s275_s0, 32, %s17_s10, [#allocation3]  }
  0x13   :  { %s169_s25 = scalar_lea.hbm %s276_s1, 64 }
  0x14   :  { %p170_p8 = scmp.ne.s32.totalorder %s276_s1, %s169_s25  ;;  %p173_p9 = scmp.lt.u32.totalorder %s169_s25, %s276_s1 }
  0x16   :  { %p175_p10 = pnand %p173_p9, %p170_p8 }
  0x18   :  { %178 = shalt.err (!%p175_p10)
}
  0x19   :  { %s179_s30 = scalar_lea.vmem %s27_s12, 64  ;;  %p184_p12 = scmp.lt.s32.totalorder %s27_s12, %s27_s12 }
  0x1a   :  { %p180_p11 = scmp.ne.s32.totalorder %s27_s12, %s179_s30  ;;  %p185_p13 = scmp.lt.s32.totalorder %s179_s30, %s179_s30 }
  0x1c   :  { %p186_p0 = por %p185_p13, %p184_p12 }
  0x1e   :  { %p187_p1 = pnand %p186_p0, %p180_p11 }
  0x20   :  { %190 = shalt.err (!%p187_p1)
}
  0x21   :  { %29 = dma.hbm_to_vmem [thread:$0]  %s276_s1, 64, %s27_s12, [#allocation6]  }
  0x22   :  { %213 = dma.done.wait [#allocation3], 32  }
  0x23   :  { %214 = vsyncadd [#allocation3], 4294967264 }
  0x24   :  { %215 = dma.done.wait [#allocation6], 64  }
  0x25   :  { %216 = vsyncadd [#allocation6], 4294967232  ;;  %v221_v0 = vmov 0.0   ;;  %vm222_vm0 = vmmov 0   ;;  %vm42_vm1 = vcmask 1043456   ;;  %vm38_vm2 = vcmask 31744  }
  0x26   :  { %137 = vmatprep.subr.mxu0 %v221_v0  ;;  %139 = vmatprep.mubr.msk.f32.mxu0 %vm222_vm0, %v221_v0  ;;  %v37_v1 = vld [vmem:[#allocation5] sm:$0xf]  ;;  %v36_v2 = vld [vmem:[#allocation2] sm:$0x3]  ;;  %s223_s4 = smov [#allocation7]  }
  0x27   :  { %138 = vmatpush3.msk.msra.mxu0 %vm42_vm1, %v37_v1  ;;  %s123_s5 = sshll.u32 %s223_s4, 4  ;;  %s124_s5 = int_to_ptr.vmem [resolvable:$true] %s123_s5 }
  0x28   :  { %140 = vmatmul.mubr.msk.f32.vlgmr.msra.gmra.mrb[0].mxu0 %vm38_vm2, %v36_v2  ;;  %s191_s1 = scalar_lea.vmem %s124_s5, 32  ;;  %p196_p3 = scmp.lt.s32.totalorder %s124_s5, %s124_s5 }
  0x29   :  { %p192_p2 = scmp.ne.s32.totalorder %s124_s5, %s191_s1  ;;  %p197_p4 = scmp.lt.s32.totalorder %s191_s1, %s191_s1 }
  0x2b   :  { %p198_p5 = por %p197_p4, %p196_p3 }
  0x2d   :  { %p199_p6 = pnand %p198_p5, %p192_p2 }
  0xfb   :  { %v112_v3 = vpop.f32.mrb[0].mxu0 }
  0xfc   :  { %116 = vst [vmem:[#allocation7] sm:$0x3] %v112_v3  ;;  %v141_v4 = vpop.f32.mrb[1].mxu0 }
  0xfd   :  { %202 = shalt.err (!%p199_p6)
}
  0xfe   :  { %s203_s8 = scalar_lea.hbm %s277_s2, 32 }
  0xff   :  { %p204_p7 = scmp.ne.s32.totalorder %s277_s2, %s203_s8  ;;  %p207_p8 = scmp.lt.u32.totalorder %s203_s8, %s277_s2 }
 0x101   :  { %p209_p9 = pnand %p207_p8, %p204_p7 }
 0x103   :  { %212 = shalt.err (!%p209_p9)
}
 0x104   :  { %126 = dma.vmem_to_hbm [thread:$0]  %s124_s5, 32, %s277_s2, [#allocation4]  }
 0x105   :  { %217 = dma.done.wait [#allocation4], 32  }
 0x106   :  { %218 = vsyncadd [#allocation4], 4294967264 }
 0x107   :  { %130 = vsyncpa [#allocation3], 1 }
 0x108   :  { %131 = vsyncpa [#allocation6], 1 }
 0x109   :  { %132 = vsyncpa [#allocation4], 1 }

</bundles_post_ra>
